<compile_context>
chip_gen: v5e
topology: v5e:2x2
jax: 0.10.0
libtpu: 0.0.40
codegen_flags: <defaults>
</compile_context>

<pallas_src>
import jax
import jax.numpy as jnp
from jax.experimental import pallas as pl
from jax.experimental.pallas import tpu as pltpu

_LANES = 128           # vreg lane width (fast axis)
_SUBLANES = 8          # f32 sublane granularity
_MAX_TILE_ROWS = 4096  # (4096, 128) f32 = 2 MiB / block; 2 bufs x (in+out) = 8 MiB VMEM


def _critic_kernel(w_ref, x_ref, o_ref):
    # w_ref: (1, 1) f32 weight in SMEM (scalar broadcast).
    # x_ref / o_ref: (TR, 128) dense, (8,128)-aligned tiles in VMEM.
    # Pure VPU broadcast multiply; compute in f32, downcast only at the store
    # (no-op for f32 inputs, correct epilogue path for bf16 activations).
    o_ref[...] = (x_ref[...] * w_ref[0, 0]).astype(o_ref.dtype)


def critic_net_forward(x, w):
    """Pallas CriticNet.forward: y = x @ W.T with W of shape (1, 1), no bias."""
    B, IN = x.shape
    OUT, IN_w = w.shape
    assert IN == 1 and OUT == 1 and IN_w == 1, "CriticNet is Linear(1, 1, bias=False)"
    # TODO(synk): a general (OUT, IN) linear would instead be a tiled MXU matmul
    # kernel (f32 VMEM accumulator, reduction axis last + "arbitrary").

    # ---- layout: dense (rows, 128) slab, (8,128)-aligned, minimal padding ----
    rows = pl.cdiv(B, _LANES)
    rows_pad = pl.cdiv(rows, _SUBLANES) * _SUBLANES           # sublane multiple (>= 8)

    grid_b = pl.cdiv(rows_pad, _MAX_TILE_ROWS)
    if rows_pad >= 2 * _SUBLANES:
        grid_b = max(grid_b, 2)       # >=2 grid steps so v7x megacore keeps both TCs busy
    tile_rows = pl.cdiv(pl.cdiv(rows_pad, grid_b), _SUBLANES) * _SUBLANES
    rows_pad = grid_b * tile_rows     # over-pad bounded by < 8 rows per grid step
    n_pad = rows_pad * _LANES

    itemsize = jnp.dtype(x.dtype).itemsize
    x_flat = x.reshape(-1)                               # (B, 1) -> (B,): metadata only
    if n_pad != B:
        x_flat = jnp.pad(x_flat, (0, n_pad - B))         # zero-fill the small tail
    x_slab = x_flat.reshape(rows_pad, _LANES)            # metadata only
    w_s = w.astype(jnp.float32)                          # (1, 1) scalar weight -> SMEM

    out_slab = pl.pallas_call(
        _critic_kernel,
        out_shape=jax.ShapeDtypeStruct((rows_pad, _LANES), x.dtype),
        grid_spec=pltpu.PrefetchScalarGridSpec(
            num_scalar_prefetch=0,
            grid=(grid_b,),
            in_specs=[
                # Whole (1, 1) weight in SMEM — read once as a scalar.
                pl.BlockSpec(memory_space=pltpu.MemorySpace.SMEM),
                # Dense, lane+sublane-full batch tiles in VMEM.
                pl.BlockSpec((tile_rows, _LANES), lambda i: (i, 0)),
            ],
            out_specs=pl.BlockSpec((tile_rows, _LANES), lambda i: (i, 0)),
        ),
        compiler_params=pltpu.CompilerParams(
            dimension_semantics=("parallel",),
        ),
        cost_estimate=pl.CostEstimate(
            flops=2 * B * IN * OUT,
            transcendentals=0,
            bytes_accessed=2 * n_pad * itemsize + 4,     # x read + y write + scalar w
        ),
    )(w_s, x_slab)

    # Undo the layout plumbing: back to nn.Linear's (B, OUT) output.  When B
    # fills the slab exactly, the slice is skipped and this is pure metadata.
    y_flat = out_slab.reshape(-1)
    if n_pad != B:
        y_flat = y_flat[:B]
    return y_flat.reshape(B, OUT)


if __name__ == "__main__":
    key = jax.random.PRNGKey(0)
    kx, kw = jax.random.split(key)

    # CriticNet: nn.Linear(1, 1, bias=False) -> weight shape (1, 1)
    B, IN, OUT = 8, 1, 1
    x = jax.random.normal(kx, (B, IN), dtype=jnp.float32)
    w = jax.random.uniform(kw, (OUT, IN), dtype=jnp.float32, minval=-1.0, maxval=1.0)

    y = critic_net_forward(x, w)
    jax.block_until_ready(y)

    y_ref = x @ w.T
    assert y.shape == (B, OUT)
    assert jnp.allclose(y, y_ref, atol=1e-6, rtol=1e-6), "mismatch vs reference"

    # Second sanity check: a batch that exercises the multi-block 'parallel'
    # grid path (rows_pad=16 -> 2 grid steps) and the ragged tail slice.
    B2 = 1025
    x2 = jax.random.normal(kx, (B2, IN), dtype=jnp.float32)
    y2 = critic_net_forward(x2, w)
    jax.block_until_ready(y2)
    assert y2.shape == (B2, OUT)
    assert jnp.allclose(y2, x2 @ w.T, atol=1e-6, rtol=1e-6), "mismatch vs reference (B=1025)"

    print("KERNEL_OK")
</pallas_src>

<mosaic_0001>
module attributes {stable_mosaic.version = 11 : i64} {
  func.func @_critic_kernel(%arg0: i32, %arg1: memref<1x1xf32, #tpu.memory_space<smem>>, %arg2: memref<8x128xf32, #tpu.memory_space<vmem>>, %arg3: memref<8x128xf32, #tpu.memory_space<vmem>>) attributes {dimension_semantics = [#tpu.dimension_semantics<parallel>], iteration_bounds = array<i64: 1>, scalar_prefetch = 0 : i64, scratch_operands = 0 : i64, tpu.core_type = #tpu.core_type<tc>, window_params = [{transform_indices = @transform_0, window_bounds = array<i64: 1, 1>}, {transform_indices = @transform_1, window_bounds = array<i64: 8, 128>}, {transform_indices = @transform_2, window_bounds = array<i64: 8, 128>}]} {
    %c0 = arith.constant 0 : index
    %c0_0 = arith.constant 0 : index
    %0 = vector.load %arg2[%c0, %c0_0] : memref<8x128xf32, #tpu.memory_space<vmem>>, vector<8x128xf32>
    %c0_1 = arith.constant 0 : index
    %c0_2 = arith.constant 0 : index
    %1 = memref.load %arg1[%c0_1, %c0_2] : memref<1x1xf32, #tpu.memory_space<smem>>
    %2 = vector.broadcast %1 : f32 to vector<8x128xf32>
    %3 = arith.mulf %0, %2 : vector<8x128xf32>
    %c0_3 = arith.constant 0 : index
    %c0_4 = arith.constant 0 : index
    %4 = vector.load %arg3[%c0_3, %c0_4] : memref<8x128xf32, #tpu.memory_space<vmem>>, vector<8x128xf32>
    tpu.vector_store %arg3[%c0_3, %c0_4], %3 {strides = array<i32>} : memref<8x128xf32, #tpu.memory_space<vmem>>, vector<8x128xf32>,
    return
  }
  func.func @transform_0(%arg0: i32) -> (i32, i32) {
    %c0_i32 = arith.constant 0 : i32
    %c0_i32_0 = arith.constant 0 : i32
    %c0_i32_1 = arith.constant 0 : i32
    return %c0_i32, %c0_i32_0 : i32, i32
  }
  func.func @transform_1(%arg0: i32) -> (i32, i32) {
    %c0_i32 = arith.constant 0 : i32
    %c0_i32_0 = arith.constant 0 : i32
    return %arg0, %c0_i32 : i32, i32
  }
  func.func @transform_2(%arg0: i32) -> (i32, i32) {
    %c0_i32 = arith.constant 0 : i32
    %c0_i32_0 = arith.constant 0 : i32
    return %arg0, %c0_i32 : i32, i32
  }
}

</mosaic_0001>

<bundles_post_ra>
// kernel: tpu_custom_call.1
= control target key start
LH: loop header
LB: loop body
LE: loop exit
PB: predicated region body
PF: predicated region fallthrough
CT: control target
= control target key end

     0   :  { %8 = vsyncpa [#allocation4], 0  ;;  %s129_s0 = inlined_call_operand.<no memory space> [shape: f32[1,1], index: 0, kind: input, shape index: {}]   ;;  %s130_s1 = inlined_call_operand.hbm [shape: f32[8,128], index: 1, kind: input, shape index: {}]   ;;  %s131_s2 = inlined_call_operand.hbm [shape: f32[8,128], index: 2, kind: output, shape index: {}]  }
   0x1   :  { %9 = vsyncpa [#allocation5], 0  ;;  %s17_s11 = sshll.u32 %s130_s1, 4  ;;  %s103_s12 = smov [#allocation3]   ;;  %s18_s11 = int_to_ptr.hbm [resolvable:$true] %s17_s11 }
   0x2   :  { %s19_s13 = sshll.u32 %s103_s12, 4  ;;  %s20_s13 = int_to_ptr.vmem [resolvable:$true] %s19_s13 }
   0x3   :  { %22 = dma.hbm_to_vmem [thread:$0]  %s18_s11, 128, %s20_s13, [#allocation4]  }
   0x4   :  { %99 = dma.done.wait [#allocation4], 128  }
   0x5   :  { %100 = vsyncadd [#allocation4], 4294967168  ;;  %v29_v0 = vstv %s129_s0  ;;  %s104_s16 = smov [#allocation6]   ;;  %s39_s20 = sshll.u32 %s131_s2, 4  ;;  %v27_v1 = vld [vmem:[#allocation3] sm:$0xff]  ;;  %s40_s20 = int_to_ptr.hbm [resolvable:$true] %s39_s20 }
   0x6   :  { %s37_s17 = sshll.u32 %s104_s16, 4  ;;  %v30_v2 = vmul.f32 %v29_v0, %v27_v1  ;;  %s38_s17 = int_to_ptr.vmem [resolvable:$true] %s37_s17 }
   0x8   :  { %31 = vst [vmem:[#allocation6] sm:$0xff] %v30_v2 }
   0x9   :  { %42 = dma.vmem_to_hbm [thread:$0]  %s38_s17, 128, %s40_s20, [#allocation5]  }
   0xa   :  { %101 = dma.done.wait [#allocation5], 128  }
   0xb   :  { %102 = vsyncadd [#allocation5], 4294967168 }
   0xc   :  { %47 = vsyncpa [#allocation4], 1 }
   0xd   :  { %48 = vsyncpa [#allocation5], 1 }

</bundles_post_ra>
